<compile_context>
chip_gen: v7x
topology: tpu7x:2x2x1
jax: 0.10.0
libtpu: 0.0.40
codegen_flags: <defaults>
</compile_context>

<pallas_src>
import functools

import jax
import jax.numpy as jnp
from jax.experimental import pallas as pl
from jax.experimental.pallas import tpu as pltpu


def _round_up(x, m):
    return ((x + m - 1) // m) * m


def _vmem_capacity_bytes():
    """Physical VMEM capacity (falls back to 128 MiB if the query fails)."""
    try:
        info = pltpu.get_tpu_info()
        cap = getattr(info, "vmem_capacity_bytes", None)
        if cap:
            return int(cap)
    except Exception:
        pass
    return 128 * 1024 * 1024


def _pick_tm(M, tm_max):
    """Row tile: bounded padding waste, >=2 row blocks when possible (megacore)."""
    n = max(pl.cdiv(M, tm_max), 2 if M >= 16 else 1)
    return max(8, _round_up(pl.cdiv(M, n), 8))


def _pick_tk(hid_p, target):
    """Largest 128-multiple divisor of hid_p near `target`.

    Avoids collapsing to tiny 128-wide slivers for awkward hidden sizes
    (e.g. 640): if the best divisor <= target is far below target, take the
    smallest divisor >= target instead.
    """
    target = max(128, min(target, hid_p))
    units, tgt_u = hid_p // 128, target // 128
    best = max(u for u in range(1, tgt_u + 1) if units % u == 0)
    if best * 2 < tgt_u:
        best = min(u for u in range(tgt_u, units + 1) if units % u == 0)
    return 128 * best


# ----------------------------------------------------------------------------
# Kernels
# ----------------------------------------------------------------------------
def _resident_kernel(x_ref, w1_ref, b1_ref, w2_ref, b2_ref, o_ref):
    """Weights fully VMEM-resident; grid = (row blocks,)."""
    x = x_ref[...].astype(w1_ref.dtype)          # in-kernel cast, hides under MXU
    h = jnp.dot(x, w1_ref[...], preferred_element_type=jnp.float32)
    h = jnp.maximum(h + b1_ref[...], 0.0)        # bias+ReLU in f32 (v5e VPU has no bf16)
    # TODO(synk): train-mode dropout mask (* 1/(1-p)) would be applied to `h` here.
    out = jnp.dot(h.astype(w2_ref.dtype), w2_ref[...],
                  preferred_element_type=jnp.float32)
    o_ref[...] = (out + b2_ref[...]).astype(o_ref.dtype)


def _make_streamed_kernel(cast_x):
    """Streamed weights; grid = (row blocks, hidden blocks), acc in f32 VMEM."""

    def kernel(x_ref, w1_ref, b1_ref, w2_ref, b2_ref, o_ref, acc_ref, *maybe_xc):
        k = pl.program_id(1)
        if cast_x:
            (xc_ref,) = maybe_xc

            @pl.when(k == 0)
            def _init():
                acc_ref[...] = jnp.zeros_like(acc_ref)
                # x block is resident across k -> cast once per row block.
                xc_ref[...] = x_ref[...].astype(xc_ref.dtype)

            xv = xc_ref[...]
        else:
            @pl.when(k == 0)
            def _init():
                acc_ref[...] = jnp.zeros_like(acc_ref)

            xv = x_ref[...]

        # fc1 partial: (tm, dim_p) @ (dim_p, tk_h) on the MXU, f32 accumulate.
        h = jnp.dot(xv, w1_ref[...], preferred_element_type=jnp.float32)
        h = jnp.maximum(h + b1_ref[...], 0.0)
        # TODO(synk): train-mode dropout mask would be applied to `h` here.

        # fc2 partial: (tm, tk_h) @ (tk_h, dim_p), accumulated across k in f32.
        acc_ref[...] += jnp.dot(h.astype(w2_ref.dtype), w2_ref[...],
                                preferred_element_type=jnp.float32)

        @pl.when(k == pl.num_programs(1) - 1)
        def _finalize():
            o_ref[...] = (acc_ref[...] + b2_ref[...]).astype(o_ref.dtype)

    return kernel


# ----------------------------------------------------------------------------
# Parameter prep (one-time, at model-load)
# ----------------------------------------------------------------------------
def prepare_ffn_params(w1, b1, w2, b2, compute_dtype=jnp.bfloat16):
    """One-time parameter prep (do at model-load time, NOT per forward call).

    PyTorch nn.Linear layout in:  w1 (hidden, dim), b1 (hidden,),
                                  w2 (dim, hidden), b2 (dim,).
    Out: weights transposed to (in, out), feature dims zero-padded to multiples
    of 128 (lane-dense tiles), cast to compute_dtype (bf16 default: halves DMA
    and runs the MXU at native rate).  Biases stay f32 (added to the f32
    accumulator in-kernel).
    """
    hidden, dim = w1.shape
    assert w2.shape == (dim, hidden)
    assert b1.shape == (hidden,) and b2.shape == (dim,)
    dim_p = _round_up(dim, 128)
    hid_p = _round_up(hidden, 128)
    cdt = compute_dtype if compute_dtype is not None else w1.dtype

    w1_t = jnp.pad(jnp.transpose(w1).astype(cdt),
                   ((0, dim_p - dim), (0, hid_p - hidden)))        # (dim_p, hid_p)
    w2_t = jnp.pad(jnp.transpose(w2).astype(cdt),
                   ((0, hid_p - hidden), (0, dim_p - dim)))        # (hid_p, dim_p)
    b1_p = jnp.pad(b1.astype(jnp.float32), (0, hid_p - hidden)).reshape(1, hid_p)
    b2_p = jnp.pad(b2.astype(jnp.float32), (0, dim_p - dim)).reshape(1, dim_p)
    return w1_t, b1_p, w2_t, b2_p


# ----------------------------------------------------------------------------
# Forward
# ----------------------------------------------------------------------------
def feedforward_pallas(x, w1_t, b1, w2_t, b2, *, tm=None, tk_h=512, resident=None):
    """Fused FFN forward.  x: (B, S, dim); weights from prepare_ffn_params.

    resident: None = auto (weights-resident path when they fit VMEM),
              True/False = force.
    """
    B, S, dim = x.shape
    dim_p, hid_p = w1_t.shape
    assert dim <= dim_p and dim_p % 128 == 0 and hid_p % 128 == 0
    assert w2_t.shape == (hid_p, dim_p)
    assert b1.shape == (1, hid_p) and b2.shape == (1, dim_p)

    cap = _vmem_capacity_bytes()
    budget = int(0.70 * cap)                      # v5e/v6e ~90 MiB, v7x ~45 MiB
    if tm is None:
        tm = 512 if cap >= 96 * 1024 * 1024 else 256   # 128 MiB chips vs v7x 64 MiB

    cdt = w1_t.dtype
    wsz = jnp.dtype(cdt).itemsize
    xsz = jnp.dtype(x.dtype).itemsize
    osz = xsz
    M = B * S

    tm = _pick_tm(M, tm)
    tk_h = _pick_tk(hid_p, tk_h)
    cast_x = (cdt != x.dtype)
    bias_bytes = 2 * 4 * (hid_p + dim_p)

    def resident_bytes(tm_):
        return (2 * 2 * dim_p * hid_p * wsz          # W1+W2 (conservative 2-buf)
                + bias_bytes
                + 2 * tm_ * dim_p * (xsz + osz)      # x + out tiles, 2-buffered
                + tm_ * hid_p * 4 + tm_ * dim_p * 4)  # f32 temporaries

    def streamed_bytes(tm_, tk_):
        b = (2 * tm_ * dim_p * (xsz + osz)           # x + out tiles, 2-buffered
             + 2 * 2 * dim_p * tk_ * wsz             # W1 + W2 tiles, 2-buffered
             + bias_bytes
             + tm_ * dim_p * 4                       # f32 accumulator scratch
             + tm_ * tk_ * 4 + tm_ * dim_p * 4)      # f32 temporaries
        if cast_x:
            b += tm_ * dim_p * wsz                   # per-row-block cast scratch
        return b

    headroom = 2 << 20
    use_resident = resident
    if use_resident is None:
        use_resident = resident_bytes(tm) + headroom <= budget

    if not use_resident:
        # Shrink tiles until the streamed footprint fits the VMEM budget.
        while streamed_bytes(tm, tk_h) + headroom > budget and tk_h > 128:
            tk_h = _pick_tk(hid_p, max(128, tk_h // 2))
        while streamed_bytes(tm, tk_h) + headroom > budget and tm > 16:
            tm = max(8, _round_up(tm // 2, 8))

    M_p = _round_up(M, tm)
    n_row = M_p // tm

    # No per-call cast; padding only when shapes demand it (keep dim % 128 == 0
    # and M % tm == 0 upstream to make this a pure reshape).
    x2 = x.reshape(M, dim)
    needs_pad = (M_p != M) or (dim_p != dim)
    if needs_pad:
        x2 = jnp.pad(x2, ((0, M_p - M), (0, dim_p - dim)))

    n_pass = 1 if use_resident else n_row
    cost = pl.CostEstimate(
        flops=4 * M_p * dim_p * hid_p,               # two matmuls, 2*M*K*N each
        transcendentals=0,
        bytes_accessed=(M_p * dim_p * (xsz + osz)
                        + n_pass * 2 * dim_p * hid_p * wsz
                        + 4 * (hid_p + dim_p)),
    )

    if use_resident:
        vmem_limit = min(budget, max(resident_bytes(tm) + (4 << 20), 32 << 20))
        grid_spec = pltpu.PrefetchScalarGridSpec(
            num_scalar_prefetch=0,
            grid=(n_row,),
            in_specs=[
                pl.BlockSpec((tm, dim_p), lambda i: (i, 0)),       # x row-block
                pl.BlockSpec((dim_p, hid_p), lambda i: (0, 0)),    # W1 (resident)
                pl.BlockSpec((1, hid_p), lambda i: (0, 0)),        # b1
                pl.BlockSpec((hid_p, dim_p), lambda i: (0, 0)),    # W2 (resident)
                pl.BlockSpec((1, dim_p), lambda i: (0, 0)),        # b2
            ],
            out_specs=pl.BlockSpec((tm, dim_p), lambda i: (i, 0)),
        )
        kernel = _resident_kernel
        dim_sem = ("parallel",)
    else:
        n_hid = hid_p // tk_h
        scratch = [pltpu.VMEM((tm, dim_p), jnp.float32)]           # f32 accumulator
        if cast_x:
            scratch.append(pltpu.VMEM((tm, dim_p), cdt))           # cast-once x
        vmem_limit = min(budget, max(streamed_bytes(tm, tk_h) + (4 << 20), 32 << 20))
        grid_spec = pltpu.PrefetchScalarGridSpec(
            num_scalar_prefetch=0,
            grid=(n_row, n_hid),
            in_specs=[
                pl.BlockSpec((tm, dim_p), lambda i, k: (i, 0)),    # x row-block
                pl.BlockSpec((dim_p, tk_h), lambda i, k: (0, k)),  # W1 hidden-slice
                pl.BlockSpec((1, tk_h), lambda i, k: (0, k)),      # b1 hidden-slice
                pl.BlockSpec((tk_h, dim_p), lambda i, k: (k, 0)),  # W2 hidden-slice
                pl.BlockSpec((1, dim_p), lambda i, k: (0, 0)),     # b2
            ],
            out_specs=pl.BlockSpec((tm, dim_p), lambda i, k: (i, 0)),
            scratch_shapes=scratch,
        )
        kernel = _make_streamed_kernel(cast_x)
        dim_sem = ("parallel", "arbitrary")

    out2 = pl.pallas_call(
        kernel,
        out_shape=jax.ShapeDtypeStruct((M_p, dim_p), x.dtype),
        grid_spec=grid_spec,
        compiler_params=pltpu.CompilerParams(
            dimension_semantics=dim_sem,
            vmem_limit_bytes=int(vmem_limit),
        ),
        cost_estimate=cost,
    )(x2, w1_t, b1, w2_t, b2)

    if needs_pad:
        out2 = out2[:M, :dim]
    return out2.reshape(B, S, dim)


def feedforward_ref(x, w1, b1, w2, b2):
    """Pure-JAX reference matching the PyTorch forward (eval mode)."""
    h = jnp.maximum(x @ w1.T + b1, 0.0)
    return h @ w2.T + b2


if __name__ == "__main__":
    # Small shapes consistent with the module: tokens = batch*seq, dim, hidden.
    batch, seq, dim, hidden = 2, 8, 32, 64

    key = jax.random.PRNGKey(0)
    kx, kw1, kb1, kw2, kb2 = jax.random.split(key, 5)

    x = jax.random.normal(kx, (batch, seq, dim), dtype=jnp.float32)
    # PyTorch nn.Linear parameter shapes: weight (out, in), bias (out,)
    w1 = jax.random.normal(kw1, (hidden, dim), dtype=jnp.float32) * 0.05
    b1 = jax.random.normal(kb1, (hidden,), dtype=jnp.float32) * 0.05
    w2 = jax.random.normal(kw2, (dim, hidden), dtype=jnp.float32) * 0.05
    b2 = jax.random.normal(kb2, (dim,), dtype=jnp.float32) * 0.05

    ref = feedforward_ref(x, w1, b1, w2, b2)

    # 1) f32 weights, auto (weights-resident) path -- tight tolerance.
    p_f32 = prepare_ffn_params(w1, b1, w2, b2, compute_dtype=jnp.float32)
    out = jax.block_until_ready(jax.jit(feedforward_pallas)(x, *p_f32))
    assert out.shape == (batch, seq, dim) and out.dtype == x.dtype
    assert jnp.allclose(out, ref, atol=1e-4, rtol=1e-4), "f32 resident mismatch"

    # 2) bf16 weights (new default), auto path -- mixed-precision tolerance.
    p_bf16 = prepare_ffn_params(w1, b1, w2, b2)   # compute_dtype=bf16 default
    out = jax.block_until_ready(jax.jit(feedforward_pallas)(x, *p_bf16))
    assert out.shape == (batch, seq, dim) and out.dtype == x.dtype
    assert jnp.allclose(out, ref, atol=2e-2, rtol=2e-2), "bf16 resident mismatch"

    # 3) bf16 weights, forced streamed path -- exercises the k-blocked
    #    accumulator + in-kernel cast-once scratch used for large dims.
    ffn_stream = jax.jit(functools.partial(feedforward_pallas, resident=False))
    out = jax.block_until_ready(ffn_stream(x, *p_bf16))
    assert out.shape == (batch, seq, dim) and out.dtype == x.dtype
    assert jnp.allclose(out, ref, atol=2e-2, rtol=2e-2), "bf16 streamed mismatch"

    print("KERNEL_OK")
</pallas_src>

<mosaic_0001>
module attributes {stable_mosaic.version = 11 : i64} {
  func.func @_resident_kernel(%arg0: i32, %arg1: memref<8x128xf32, #tpu.memory_space<vmem>>, %arg2: memref<128x128xf32, #tpu.memory_space<vmem>>, %arg3: memref<1x128xf32, #tpu.memory_space<vmem>>, %arg4: memref<128x128xf32, #tpu.memory_space<vmem>>, %arg5: memref<1x128xf32, #tpu.memory_space<vmem>>, %arg6: memref<8x128xf32, #tpu.memory_space<vmem>>) attributes {dimension_semantics = [#tpu.dimension_semantics<parallel>], iteration_bounds = array<i64: 2>, scalar_prefetch = 0 : i64, scratch_operands = 0 : i64, tpu.core_type = #tpu.core_type<tc>, window_params = [{transform_indices = @transform_0, window_bounds = array<i64: 8, 128>}, {pipeline_mode = #tpu.pipeline_mode<synchronous>, transform_indices = @transform_1, window_bounds = array<i64: 128, 128>}, {pipeline_mode = #tpu.pipeline_mode<synchronous>, transform_indices = @transform_2, window_bounds = array<i64: 1, 128>}, {pipeline_mode = #tpu.pipeline_mode<synchronous>, transform_indices = @transform_3, window_bounds = array<i64: 128, 128>}, {pipeline_mode = #tpu.pipeline_mode<synchronous>, transform_indices = @transform_4, window_bounds = array<i64: 1, 128>}, {transform_indices = @transform_5, window_bounds = array<i64: 8, 128>}]} {
    %c0 = arith.constant 0 : index
    %c0_0 = arith.constant 0 : index
    %0 = vector.load %arg1[%c0, %c0_0] : memref<8x128xf32, #tpu.memory_space<vmem>>, vector<8x128xf32>
    %c0_1 = arith.constant 0 : index
    %c0_2 = arith.constant 0 : index
    %1 = vector.load %arg2[%c0_1, %c0_2] : memref<128x128xf32, #tpu.memory_space<vmem>>, vector<128x128xf32>
    %cst = arith.constant dense<0.000000e+00> : vector<8x128xf32>
    %2 = tpu.matmul %0, %1, %cst {dimension_numbers = #tpu.dot_dimension_numbers<[1], [0], [0], [1], [0, 0, 1, 1], [], []>} : vector<8x128xf32>, vector<128x128xf32>, vector<8x128xf32> -> vector<8x128xf32>
    %c0_3 = arith.constant 0 : index
    %c0_4 = arith.constant 0 : index
    %3 = vector.load %arg3[%c0_3, %c0_4] : memref<1x128xf32, #tpu.memory_space<vmem>>, vector<1x128xf32>
    %4 = vector.broadcast %3 : vector<1x128xf32> to vector<8x128xf32>
    %5 = arith.addf %2, %4 : vector<8x128xf32>
    %cst_5 = arith.constant 0.000000e+00 : f32
    %6 = vector.broadcast %cst_5 : f32 to vector<8x128xf32>
    %7 = arith.maximumf %5, %6 : vector<8x128xf32>
    %c0_6 = arith.constant 0 : index
    %c0_7 = arith.constant 0 : index
    %8 = vector.load %arg4[%c0_6, %c0_7] : memref<128x128xf32, #tpu.memory_space<vmem>>, vector<128x128xf32>
    %cst_8 = arith.constant dense<0.000000e+00> : vector<8x128xf32>
    %9 = tpu.matmul %7, %8, %cst_8 {dimension_numbers = #tpu.dot_dimension_numbers<[1], [0], [0], [1], [0, 0, 1, 1], [], []>} : vector<8x128xf32>, vector<128x128xf32>, vector<8x128xf32> -> vector<8x128xf32>
    %c0_9 = arith.constant 0 : index
    %c0_10 = arith.constant 0 : index
    %10 = vector.load %arg5[%c0_9, %c0_10] : memref<1x128xf32, #tpu.memory_space<vmem>>, vector<1x128xf32>
    %11 = vector.broadcast %10 : vector<1x128xf32> to vector<8x128xf32>
    %12 = arith.addf %9, %11 : vector<8x128xf32>
    %c0_11 = arith.constant 0 : index
    %c0_12 = arith.constant 0 : index
    %13 = vector.load %arg6[%c0_11, %c0_12] : memref<8x128xf32, #tpu.memory_space<vmem>>, vector<8x128xf32>
    tpu.vector_store %arg6[%c0_11, %c0_12], %12 {strides = array<i32>} : memref<8x128xf32, #tpu.memory_space<vmem>>, vector<8x128xf32>,
    return
  }
  func.func @transform_0(%arg0: i32) -> (i32, i32) {
    %c0_i32 = arith.constant 0 : i32
    %c0_i32_0 = arith.constant 0 : i32
    return %arg0, %c0_i32 : i32, i32
  }
  func.func @transform_1(%arg0: i32) -> (i32, i32) {
    %c0_i32 = arith.constant 0 : i32
    %c0_i32_0 = arith.constant 0 : i32
    %c0_i32_1 = arith.constant 0 : i32
    return %c0_i32, %c0_i32_0 : i32, i32
  }
  func.func @transform_2(%arg0: i32) -> (i32, i32) {
    %c0_i32 = arith.constant 0 : i32
    %c0_i32_0 = arith.constant 0 : i32
    %c0_i32_1 = arith.constant 0 : i32
    return %c0_i32, %c0_i32_0 : i32, i32
  }
  func.func @transform_3(%arg0: i32) -> (i32, i32) {
    %c0_i32 = arith.constant 0 : i32
    %c0_i32_0 = arith.constant 0 : i32
    %c0_i32_1 = arith.constant 0 : i32
    return %c0_i32, %c0_i32_0 : i32, i32
  }
  func.func @transform_4(%arg0: i32) -> (i32, i32) {
    %c0_i32 = arith.constant 0 : i32
    %c0_i32_0 = arith.constant 0 : i32
    %c0_i32_1 = arith.constant 0 : i32
    return %c0_i32, %c0_i32_0 : i32, i32
  }
  func.func @transform_5(%arg0: i32) -> (i32, i32) {
    %c0_i32 = arith.constant 0 : i32
    %c0_i32_0 = arith.constant 0 : i32
    return %arg0, %c0_i32 : i32, i32
  }
}

</mosaic_0001>

<bundles_post_ra>
// kernel: feedforward_pallas.1
= control target key start
LH: loop header
LB: loop body
LE: loop exit
PB: predicated region body
PF: predicated region fallthrough
CT: control target
= control target key end

     0   :  { %10 = vsyncpa [#allocation3], 0  ;;  %s946_s0 = inlined_call_operand.vmem [shape: f32[16,128], index: 0, kind: input, shape index: {}]   ;;  %s947_s1 = inlined_call_operand.hbm [shape: f32[128,128], index: 1, kind: input, shape index: {}]   ;;  %s948_s2 = inlined_call_operand.vmem [shape: f32[1,128], index: 2, kind: input, shape index: {}]   ;;  %s949_s3 = inlined_call_operand.hbm [shape: f32[128,128], index: 3, kind: input, shape index: {}]   ;;  %s950_s4 = inlined_call_operand.vmem [shape: f32[1,128], index: 4, kind: input, shape index: {}]   ;;  %s951_s5 = inlined_call_operand.vmem [shape: f32[16,128], index: 5, kind: output, shape index: {}]  }
   0x1   :  { %11 = vsyncpa [#allocation5], 0  ;;  %s824_s18 = smov 0  }
   0x2 LB: > { %s830_s19 = sadd.s32 4294967295, %s785_s18   ;;  %p516_p0 = scmp.ge.s32.totalorder %s785_s18, 1  ;;  %s785_s18 = sphi %s824_s18, %s17_s18  }
   0x3   : > { %p158_p1 = scmp.lt.s32.totalorder %s785_s18, 3  ;;  %s787_s20 = smov [#allocation2]  }
   0x4   : > { %s170_s21 = sshll.u32 %s787_s20, 4  ;;  %p952_p3 = scmp.eq.s32.totalorder %s830_s19, 0  ;;  %s171_s21 = int_to_ptr.vmem [resolvable:$true] %s170_s21 }
   0x5   : > { %p834_p2 = pnand %p516_p0, %p158_p1  ;;  %s788_s23 = smov [#allocation4]  }
   0x6   : > { %s186_s24 = sshll.u32 %s788_s23, 4  ;;  %s715_s28 = scalar_lea.hbm %s947_s1, 2048  ;;  %s847_s24 = int_to_ptr.vmem [resolvable:$true] %s186_s24 }
   0x7   : > { %s954_s22 = scalar_select %p834_p2, 1, 0 }
   0x8   : > { %p689_p4 = pneg %p834_p2  ;;  %p716_p6 = scmp.ne.s32.totalorder %s947_s1, %s715_s28 }
   0x9   : > { %p722_p10 = scmp.lt.u32.totalorder %s715_s28, %s947_s1 }
   0xa   : > { %p843_p5 = pnand %p952_p3, %p689_p4 }
   0xc   : > { %p717_p7 = pneg %p843_p5 }
   0xe   : > { %p718_p8 = pnand %p717_p7, %p716_p6 }
  0x10   : > { %p719_p9 = pneg %p718_p8 }
  0x12   : > { %p724_p11 = pnand %p722_p10, %p719_p9 }
  0x14   : > { %727 = shalt.err (!%p724_p11)
}
  0x15   : > { %s728_s8 = scalar_lea.vmem %s171_s21, 2048  ;;  %p736_p1 = scmp.lt.s32.totalorder %s171_s21, %s171_s21 }
  0x16   : > { %p729_p12 = scmp.ne.s32.totalorder %s171_s21, %s728_s8  ;;  %p737_p4 = scmp.lt.s32.totalorder %s728_s8, %s728_s8 }
  0x18   : > { %p731_p13 = pnand %p729_p12, %p717_p7  ;;  %p738_p3 = por %p737_p4, %p736_p1 }
  0x1a   : > { %p732_p0 = pneg %p731_p13 }
  0x1c   : > { %p739_p2 = pnand %p738_p3, %p732_p0 }
  0x1e   : > { %742 = shalt.err (!%p739_p2)
}
  0x1f   : > { %s789_s9 = smov 128   ;;  %s790_s10 = smov 8  }
  0x20   : > { %692 = dma.hbm_to_vmem [thread:$0]  (!%p843_p5), %s947_s1, 2048, %s171_s21, [#allocation3], %s789_s9, %s789_s9, %s790_s10  }
  0x21   : > { %s743_s15 = scalar_lea.hbm %s949_s3, 2048 }
  0x22   : > { %p744_p6 = scmp.ne.s32.totalorder %s949_s3, %s743_s15  ;;  %p750_p8 = scmp.lt.u32.totalorder %s743_s15, %s949_s3 }
  0x24   : > { %p746_p2 = pnand %p744_p6, %p717_p7 }
  0x26   : > { %p747_p3 = pneg %p746_p2 }
  0x28   : > { %p752_p9 = pnand %p750_p8, %p747_p3 }
  0x2a   : > { %755 = shalt.err (!%p752_p9)
}
  0x2b   : > { %s756_s21 = scalar_lea.vmem %s847_s24, 2048  ;;  %p764_p13 = scmp.lt.s32.totalorder %s847_s24, %s847_s24 }
  0x2c   : > { %p757_p10 = scmp.ne.s32.totalorder %s847_s24, %s756_s21  ;;  %p765_p0 = scmp.lt.s32.totalorder %s756_s21, %s756_s21 }
  0x2e   : > { %p759_p11 = pnand %p757_p10, %p717_p7  ;;  %p766_p1 = por %p765_p0, %p764_p13 }
  0x30   : > { %p760_p12 = pneg %p759_p11 }
  0x32   : > { %p767_p4 = pnand %p766_p1, %p760_p12 }
  0x34   : > { %770 = shalt.err (!%p767_p4)
}
  0x35   : > { %695 = dma.hbm_to_vmem [thread:$0]  (!%p843_p5), %s949_s3, 2048, %s847_s24, [#allocation5], %s789_s9, %s789_s9, %s790_s10  }
  0x36   : > { %p956_p6 = scmp.ne.s32.totalorder %s954_s22, 0 }
  0x37   : > { %p957_p2 = scmp.eq.s32.totalorder (!%p956_p6), %s830_s19, 0 }
  0x38   : > { %212 = sbr.rel (%p956_p6) target bundleno = 532 (0x214), region = 40 }
  0x3f   : > { %776 = dma.done.wait (%p957_p2), [#allocation3], 2048   ;;  %p958_p7 = pmov %p957_p2 }
  0x40   : > { %p959_p3 = pmov %p957_p2 }
  0x41   : > { %778 = vsyncadd (%p958_p7), [#allocation3], 4294965248 }
  0x42   : > { %780 = dma.done.wait (%p959_p3), [#allocation5], 2048   ;;  %p960_p8 = pmov %p957_p2 }
  0x43   : > { %v791_v0 = vmov 0.0|0.0   ;;  %vm792_vm0 = vmmov 0   ;;  %v793_v1 = vmov 0.0   ;;  %v251_v2 = vld [vmem:[#allocation2] sm:$0xff]  ;;  %v252_v3 = vld [vmem:[#allocation2 + $0x8] sm:$0xff]  ;;  %v253_v4 = vld [vmem:[#allocation2 + $0x10] sm:$0xff] }
  0x44   : > { %782 = vsyncadd (%p960_p8), [#allocation5], 4294965248  ;;  %633 = vmatprep.subr.bf16.mxu0 %v791_v0  ;;  %595 = vmatprep.mubr.msk.f32.mxu0 %vm792_vm0, %v793_v1  ;;  %v634_v5 = vpack.c.bf16 %v252_v3, %v251_v2  ;;  %v254_v6 = vld [vmem:[#allocation2 + $0x18] sm:$0xff]  ;;  %v255_v8 = vld [vmem:[#allocation2 + $0x20] sm:$0xff]  ;;  %p242_p5 = scmp.lt.s32.totalorder %s830_s19, 1 }
  0x45   : > { %657 = vmatprep.subr.bf16.mxu1 %v791_v0  ;;  %630 = vmatprep.mubr.msk.f32.mxu1 %vm792_vm0, %v793_v1  ;;  %v637_v7 = vpack.c.bf16 %v254_v6, %v253_v4  ;;  %v256_v9 = vld [vmem:[#allocation2 + $0x28] sm:$0xff]  ;;  %v345_v10 = vld [vmem:[#allocation4] sm:$0xff]  ;;  %v347_v12 = vld [vmem:[#allocation4 + $0x10] sm:$0xff] }
  0x46   : > { %635 = vmatpush3.bf16.msra.mxu0 %v634_v5  ;;  %v346_v11 = vld [vmem:[#allocation4 + $0x8] sm:$0xff]  ;;  %v348_v13 = vld [vmem:[#allocation4 + $0x18] sm:$0xff]  ;;  %v640_v14 = vpack.c.bf16 %v256_v9, %v255_v8  ;;  %v257_v16 = vld [vmem:[#allocation2 + $0x30] sm:$0xff]  ;;  %s962_s19 = smov (!%p242_p5, %s830_s19), 1 }
  0x47   : > { %636 = vmatprep.subr.bf16.mxu0 %v791_v0  ;;  %v658_v15 = vpack.c.bf16 %v346_v11, %v345_v10  ;;  %v258_v17 = vld [vmem:[#allocation2 + $0x38] sm:$0xff]  ;;  %v661_v18 = vpack.c.bf16 %v348_v13, %v347_v12  ;;  %v349_v19 = vld [vmem:[#allocation4 + $0x20] sm:$0xff]  ;;  %v350_v20 = vld [vmem:[#allocation4 + $0x28] sm:$0xff]  ;;  %s523_s22 = sshll.u32 %s962_s19, 3 }
  0x48   : > { %v643_v21 = vpack.c.bf16 %v258_v17, %v257_v16  ;;  %v259_v22 = vld [vmem:[#allocation2 + $0x40] sm:$0xff]  ;;  %v260_v23 = vld [vmem:[#allocation2 + $0x48] sm:$0xff]  ;;  %v664_v24 = vpack.c.bf16 %v350_v20, %v349_v19  ;;  %v351_v25 = vld [vmem:[#allocation4 + $0x30] sm:$0xff]  ;;  %s245_s28 = scalar_lea.vmem %s946_s0, %s523_s22  ;;  %s249_s10 = scalar_lea.vmem %s951_s5, %s523_s22 }
  0x49   : > { %659 = vmatpush3.bf16.msra.mxu1 %v658_v15  ;;  %v352_v26 = vld [vmem:[#allocation4 + $0x38] sm:$0xff]  ;;  %v646_v27 = vpack.c.bf16 %v260_v23, %v259_v22  ;;  %v261_v28 = vld [vmem:[#allocation2 + $0x50] sm:$0xff]  ;;  %v353_v31 = vld [vmem:[#allocation4 + $0x40] sm:$0xff] }
  0x4a   : > { %638 = vmatpush3.bf16.msra.mxu0 %v637_v7  ;;  %660 = vmatprep.subr.bf16.mxu1 %v791_v0  ;;  %v262_v29 = vld [vmem:[#allocation2 + $0x58] sm:$0xff]  ;;  %v667_v30 = vpack.c.bf16 %v352_v26, %v351_v25  ;;  %v354_v32 = vld [vmem:[#allocation4 + $0x48] sm:$0xff]  ;;  %v263_v34 = vld [vmem:[#allocation2 + $0x60] sm:$0xff] }
  0x4b   : > { %639 = vmatprep.subr.bf16.mxu0 %v791_v0  ;;  %v649_v33 = vpack.c.bf16 %v262_v29, %v261_v28  ;;  %v264_v35 = vld [vmem:[#allocation2 + $0x68] sm:$0xff]  ;;  %v670_v36 = vpack.c.bf16 %v354_v32, %v353_v31  ;;  %v355_v37 = vld [vmem:[#allocation4 + $0x50] sm:$0xff]  ;;  %v356_v38 = vld [vmem:[#allocation4 + $0x58] sm:$0xff] }
  0x4c   : > { %v652_v39 = vpack.c.bf16 %v264_v35, %v263_v34  ;;  %v265_v40 = vld [vmem:[#allocation2 + $0x70] sm:$0xff]  ;;  %v266_v41 = vld [vmem:[#allocation2 + $0x78] sm:$0xff]  ;;  %v673_v42 = vpack.c.bf16 %v356_v38, %v355_v37  ;;  %v357_v43 = vld [vmem:[#allocation4 + $0x60] sm:$0xff] }
  0x4d   : > { %662 = vmatpush3.bf16.msra.mxu1 %v661_v18  ;;  %v358_v44 = vld [vmem:[#allocation4 + $0x68] sm:$0xff]  ;;  %v655_v45 = vpack.c.bf16 %v266_v41, %v265_v40  ;;  %v250_v47 = vld [vmem:[%s245_s28] sm:$0xff]  ;;  %v359_v48 = vld [vmem:[#allocation4 + $0x70] sm:$0xff] }
  0x4e   : > { %641 = vmatpush3.bf16.msra.mxu0 %v640_v14  ;;  %663 = vmatprep.subr.bf16.mxu1 %v791_v0  ;;  %v676_v46 = vpack.c.bf16 %v358_v44, %v357_v43  ;;  %v360_v49 = vld [vmem:[#allocation4 + $0x78] sm:$0xff]  ;;  %v525_v51 = vld [vmem:[%s948_s2] ss:$0 sm:$0xff] }
  0x4f   : > { %642 = vmatprep.subr.bf16.mxu0 %v791_v0  ;;  %v679_v50 = vpack.c.bf16 %v360_v49, %v359_v48  ;;  %v526_v56 = vld [vmem:[%s950_s4] ss:$0 sm:$0xff] }
  0x51   : > { %665 = vmatpush3.bf16.msra.mxu1 %v664_v24 }
  0x52   : > { %644 = vmatpush3.bf16.msra.mxu0 %v643_v21  ;;  %666 = vmatprep.subr.bf16.mxu1 %v791_v0 }
  0x53   : > { %645 = vmatprep.subr.bf16.mxu0 %v791_v0 }
  0x55   : > { %668 = vmatpush3.bf16.msra.mxu1 %v667_v30 }
  0x56   : > { %647 = vmatpush3.bf16.msra.mxu0 %v646_v27  ;;  %669 = vmatprep.subr.bf16.mxu1 %v791_v0 }
  0x57   : > { %648 = vmatprep.subr.bf16.mxu0 %v791_v0 }
  0x59   : > { %671 = vmatpush3.bf16.msra.mxu1 %v670_v36 }
  0x5a   : > { %650 = vmatpush3.bf16.msra.mxu0 %v649_v33  ;;  %672 = vmatprep.subr.bf16.mxu1 %v791_v0 }
  0x5b   : > { %651 = vmatprep.subr.bf16.mxu0 %v791_v0 }
  0x5d   : > { %674 = vmatpush3.bf16.msra.mxu1 %v673_v42 }
  0x5e   : > { %653 = vmatpush3.bf16.msra.mxu0 %v652_v39  ;;  %675 = vmatprep.subr.bf16.mxu1 %v791_v0 }
  0x5f   : > { %654 = vmatprep.subr.bf16.mxu0 %v791_v0 }
  0x61   : > { %677 = vmatpush3.bf16.msra.mxu1 %v676_v46 }
  0x62   : > { %656 = vmatpush3.bf16.msra.mxu0 %v655_v45  ;;  %678 = vmatprep.subr.bf16.mxu1 %v791_v0 }
  0x65   : > { %596 = vmatmul.mubr.f32.vlgmr.msra.gmra.mrb[0].mxu0 %v250_v47  ;;  %680 = vmatpush3.bf16.msra.mxu1 %v679_v50 }
 0x138   : > { %v340_v52 = vpop.f32.mrb[0].mxu0 }
 0x139   : > { %v341_v53 = vadd.f32 %v525_v51, %v340_v52  ;;  %v597_v54 = vpop.f32.mrb[1].mxu0 }
 0x13b   : > { %v344_v55 = vmax.f32 %v341_v53, 0.0 }
 0x13d   : > { %631 = vmatmul.mubr.f32.vlgmr.msra.gmra.mrb[0].mxu1 %v344_v55 }
 0x210   : > { %v434_v57 = vpop.f32.mrb[0].mxu1 }
 0x211   : > { %v435_v58 = vadd.f32 %v526_v56, %v434_v57  ;;  %v632_v59 = vpop.f32.mrb[1].mxu1 }
 0x213   : > { %438 = vst [vmem:[%s249_s10] sm:$0xff] %v435_v58 }
 0x214 PF: > { %s17_s18 = sadd.s32 1, %s785_s18  }
 0x215   : > { %p14_p9 = scmp.ge.s32.totalorder %s17_s18, 4  }
 0x217   :  { %16 = sbr.rel (!%p14_p9) target bundleno = 2 (0x2), region = 79 }
 0x21e   :  { %458 = vsyncpa [#allocation3], 1 }
 0x21f   :  { %460 = vsyncpa [#allocation3 + $0x1], 1 }
 0x220   :  { %461 = vsyncpa [#allocation5], 1 }

</bundles_post_ra>
